<compile_context>
chip_gen: v5e
topology: v5e:2x2
jax: 0.10.0
libtpu: 0.0.40
codegen_flags: <defaults>
</compile_context>

<pallas_src>
import jax
import jax.numpy as jnp
from jax.experimental import pallas as pl
from jax.experimental.pallas import tpu as pltpu


def _round_up(x: int, m: int) -> int:
    return ((x + m - 1) // m) * m


def _supports_bf16_valu() -> bool:
    """bf16 elementwise is profitable only where the VPU is bf16-native (v6e+)."""
    try:
        kind = jax.devices()[0].device_kind.lower()
    except Exception:
        return False
    return not any(v in kind for v in ("v2", "v3", "v4", "v5"))


def make_encoder_kernel(num_backbone: int, elem_dtype):
    """Kernel: x(bf16), (Wb,bb)*num_backbone, W_heads, b_heads -> fused output slab."""

    def kernel(*refs):
        idx = 0
        x_ref = refs[idx]; idx += 1
        h = x_ref[...]                      # already bf16 (cast folded into wrapper pad)

        # Backbone: Linear -> ReLU (-> Dropout identity) repeated.
        # MXU consumes bf16, accumulates f32; bias+ReLU run in elem_dtype
        # (bf16 on v6e/v7x, f32 on v5e which has no bf16 VALU).
        for _ in range(num_backbone):
            w_ref, b_ref = refs[idx], refs[idx + 1]; idx += 2
            acc = jnp.dot(h, w_ref[...], preferred_element_type=jnp.float32)
            if elem_dtype != jnp.float32:
                acc = acc.astype(elem_dtype)
            h = jnp.maximum(acc + b_ref[...], 0).astype(jnp.bfloat16)

        # All heads fused into a single lane-dense matmul; bias add in f32.
        wh_ref, bh_ref = refs[idx], refs[idx + 1]; idx += 2
        o_ref = refs[idx]
        y = jnp.dot(h, wh_ref[...], preferred_element_type=jnp.float32) + bh_ref[...]
        o_ref[...] = y.astype(o_ref.dtype)

    return kernel


def _pad2(a, rows, cols, dtype):
    a = a.astype(dtype)
    return jnp.pad(a, ((0, rows - a.shape[0]), (0, cols - a.shape[1])))


def _param_block_spec(p):
    # Constant index_map => the tile is DMA'd once; a single (Buffered(1)) VMEM
    # buffer suffices and halves resident parameter VMEM vs the default 2-deep.
    try:
        return pl.BlockSpec(p.shape, lambda i: (0, 0), pipeline_mode=pl.Buffered(1))
    except TypeError:  # older BlockSpec without pipeline_mode kwarg
        return pl.BlockSpec(p.shape, lambda i: (0, 0))


def hierarchical_encoder(x, backbone_params, head_params, *, tb=None, out_dtype=None):
    """x: [B, input_dim]. backbone_params/head_params: lists of (W[in,out], b[1,out]).

    Returns a list of [B, out_dim_i] arrays (one per head), matching
    HierarchicalEncoder.forward at inference time (Dropout is identity in eval).
    """
    B, input_dim = x.shape
    num_backbone = len(backbone_params)
    output_dims = [int(w.shape[1]) for (w, _) in head_params]
    out_total = sum(output_dims)
    out_dtype = x.dtype if out_dtype is None else out_dtype
    out_itemsize = jnp.dtype(out_dtype).itemsize

    elem_dtype = jnp.bfloat16 if _supports_bf16_valu() else jnp.float32

    # ---- Lane padding (multiples of 128) for every feature dim. ----
    in_pad = _round_up(input_dim, 128)
    hidden_dims = [int(w.shape[1]) for (w, _) in backbone_params]
    hidden_pad = [_round_up(h, 128) for h in hidden_dims]
    out_pad = _round_up(out_total, 128)
    max_dim = max([in_pad, out_pad] + hidden_pad)

    # bf16 input, cast fused with the zero-pad (padded columns must stay zero so
    # padded lanes remain exactly zero through every bias+ReLU).
    xp = jnp.pad(x.astype(jnp.bfloat16), ((0, 0), (0, in_pad - input_dim)))

    # Padded bf16 weights ([in, out]); backbone biases in elem_dtype, head bias f32.
    padded_backbone = []
    cur_pad = in_pad
    for (w, b), hp in zip(backbone_params, hidden_pad):
        padded_backbone.append((
            _pad2(w, cur_pad, hp, jnp.bfloat16),
            _pad2(b, 1, hp, elem_dtype),
        ))
        cur_pad = hp

    # Fuse all heads into one weight/bias, padded to a lane-dense output slab.
    w_heads = jnp.concatenate([w for (w, _) in head_params], axis=1)   # [hidden, out_total]
    b_heads = jnp.concatenate([b for (_, b) in head_params], axis=1)   # [1, out_total]
    w_headp = _pad2(w_heads, cur_pad, out_pad, jnp.bfloat16)
    b_headp = _pad2(b_heads, 1, out_pad, jnp.float32)

    param_args = []
    for w, b in padded_backbone:
        param_args += [w, b]
    param_args += [w_headp, b_headp]
    param_bytes = sum(int(p.size) * p.dtype.itemsize for p in param_args)

    # ---- VMEM budget model (params are single-buffered; x/out double-buffered). ----
    def vmem_bytes_for(t):
        io = 2 * t * in_pad * 2 + 2 * t * out_pad * out_itemsize
        act = 4 * t * max_dim * 4          # live f32/bf16 intermediates, conservative
        return int(1.15 * (param_bytes + io + act))

    VMEM_TARGET = 48 * 1024 * 1024         # conservative vs v7x's 64 MiB physical

    # ---- Batch tiling. Large tiles (<=1024) to feed the MXU and amortize the
    # ~0.35us/step overhead, but keep >=2 grid steps so both v7x TCs get work,
    # and shrink until the VMEM budget fits. ----
    if tb is None:
        tb = min(1024, _round_up(B, 8))
        while B > 8 and _round_up(B, tb) // tb < 2 and tb > 8:
            tb = max(8, _round_up(tb // 2, 8))
        while tb > 8 and vmem_bytes_for(tb) > VMEM_TARGET:
            tb = max(8, _round_up(tb // 2, 8))
    tb = max(8, _round_up(int(tb), 8))

    Bp = _round_up(B, tb)
    if Bp != B:
        xp = jnp.pad(xp, ((0, Bp - B), (0, 0)))
    grid = (Bp // tb,)

    kernel = make_encoder_kernel(num_backbone, elem_dtype)

    in_specs = [pl.BlockSpec((tb, in_pad), lambda i: (i, 0))]
    in_specs += [_param_block_spec(p) for p in param_args]

    out_shape = jax.ShapeDtypeStruct((Bp, out_pad), out_dtype)
    out_spec = pl.BlockSpec((tb, out_pad), lambda i: (i, 0))

    # Advisory cost estimate for XLA scheduling around this call.
    flops = 0
    prev = in_pad
    for hp in hidden_pad:
        flops += 2 * Bp * prev * hp
        prev = hp
    flops += 2 * Bp * prev * out_pad
    bytes_accessed = (xp.size * xp.dtype.itemsize + param_bytes
                      + Bp * out_pad * out_itemsize)
    cost = pl.CostEstimate(flops=flops, transcendentals=0,
                           bytes_accessed=bytes_accessed)

    vmem_limit = min(max(vmem_bytes_for(tb), 32 * 1024 * 1024), 128 * 1024 * 1024)

    # TODO(synk): for very large hidden dims (bf16 layer weight >= ~8 MiB, e.g.
    # hidden >= 2048), add an "arbitrary" K-tiling grid axis (f32 accumulator +
    # pl.when init/finalize) and N-tile the fused head matmul instead of keeping
    # every weight resident — required to fit v7x's 64 MiB VMEM. Optional int8
    # (v5e/v6e) / fp8 (v7x) weight quantization would further halve weight bytes.
    out = pl.pallas_call(
        kernel,
        grid_spec=pltpu.PrefetchScalarGridSpec(
            num_scalar_prefetch=0,
            grid=grid,
            in_specs=in_specs,
            out_specs=out_spec,
        ),
        out_shape=out_shape,
        compiler_params=pltpu.CompilerParams(
            dimension_semantics=("parallel",),
            vmem_limit_bytes=vmem_limit,
        ),
        cost_estimate=cost,
    )(xp, *param_args)

    # Strip batch/lane padding and split the fused slab back into per-head outputs.
    out = out[:B]
    results, off = [], 0
    for od in output_dims:
        results.append(out[:, off:off + od])
        off += od
    return results


def init_linear(key, in_dim, out_dim, dtype=jnp.float32):
    """Deterministic init; returns (W[in,out], b[1,out]) (PyTorch weight transposed)."""
    kw, kb = jax.random.split(key)
    scale = 1.0 / jnp.sqrt(in_dim)
    w = jax.random.uniform(kw, (in_dim, out_dim), dtype, -scale, scale)
    b = jax.random.uniform(kb, (1, out_dim), dtype, -scale, scale)
    return w, b


if __name__ == "__main__":
    # Small config consistent with HierarchicalEncoder.__init__.
    input_dim = 32
    hidden_dims = [64, 32]
    output_dims = [16, 8]
    B = 16

    key = jax.random.PRNGKey(0)
    keys = jax.random.split(key, 1 + len(hidden_dims) + len(output_dims))

    x = jax.random.normal(keys[0], (B, input_dim), jnp.float32)

    backbone_params = []
    cur = input_dim
    for li, h in enumerate(hidden_dims):
        backbone_params.append(init_linear(keys[1 + li], cur, h))
        cur = h

    head_params = []
    for hi, od in enumerate(output_dims):
        head_params.append(init_linear(keys[1 + len(hidden_dims) + hi], cur, od))

    outs = hierarchical_encoder(x, backbone_params, head_params)
    outs = jax.block_until_ready(outs)

    # Pure-JAX f32 reference (Dropout is identity at inference).
    h = x
    for w, b in backbone_params:
        h = jnp.maximum(h @ w + b, 0.0)
    refs = [h @ w + b for (w, b) in head_params]

    # Tolerance reflects intentional bf16 matmul inputs / activations
    # (f32 accumulation) vs the f32 reference.
    for o, r in zip(outs, refs):
        assert o.shape == r.shape, (o.shape, r.shape)
        assert jnp.allclose(o, r, atol=5e-2, rtol=5e-2), float(jnp.abs(o - r).max())

    print("KERNEL_OK")
</pallas_src>

<mosaic_0001>
module attributes {stable_mosaic.version = 11 : i64} {
  func.func @kernel(%arg0: i32, %arg1: memref<8x128xbf16, #tpu.memory_space<vmem>>, %arg2: memref<128x128xbf16, #tpu.memory_space<vmem>>, %arg3: memref<1x128xbf16, #tpu.memory_space<vmem>>, %arg4: memref<128x128xbf16, #tpu.memory_space<vmem>>, %arg5: memref<1x128xbf16, #tpu.memory_space<vmem>>, %arg6: memref<128x128xbf16, #tpu.memory_space<vmem>>, %arg7: memref<1x128xf32, #tpu.memory_space<vmem>>, %arg8: memref<8x128xf32, #tpu.memory_space<vmem>>) attributes {dimension_semantics = [#tpu.dimension_semantics<parallel>], iteration_bounds = array<i64: 2>, scalar_prefetch = 0 : i64, scratch_operands = 0 : i64, tpu.core_type = #tpu.core_type<tc>, window_params = [{transform_indices = @transform_0, window_bounds = array<i64: 8, 128>}, {pipeline_mode = #tpu.pipeline_mode<synchronous>, transform_indices = @transform_1, window_bounds = array<i64: 128, 128>}, {pipeline_mode = #tpu.pipeline_mode<synchronous>, transform_indices = @transform_2, window_bounds = array<i64: 1, 128>}, {pipeline_mode = #tpu.pipeline_mode<synchronous>, transform_indices = @transform_3, window_bounds = array<i64: 128, 128>}, {pipeline_mode = #tpu.pipeline_mode<synchronous>, transform_indices = @transform_4, window_bounds = array<i64: 1, 128>}, {pipeline_mode = #tpu.pipeline_mode<synchronous>, transform_indices = @transform_5, window_bounds = array<i64: 128, 128>}, {pipeline_mode = #tpu.pipeline_mode<synchronous>, transform_indices = @transform_6, window_bounds = array<i64: 1, 128>}, {transform_indices = @transform_7, window_bounds = array<i64: 8, 128>}]} {
    %c0 = arith.constant 0 : index
    %c0_0 = arith.constant 0 : index
    %0 = vector.load %arg1[%c0, %c0_0] : memref<8x128xbf16, #tpu.memory_space<vmem>>, vector<8x128xbf16>
    %c0_1 = arith.constant 0 : index
    %c0_2 = arith.constant 0 : index
    %1 = vector.load %arg2[%c0_1, %c0_2] : memref<128x128xbf16, #tpu.memory_space<vmem>>, vector<128x128xbf16>
    %cst = arith.constant dense<0.000000e+00> : vector<8x128xf32>
    %2 = tpu.matmul %0, %1, %cst {dimension_numbers = #tpu.dot_dimension_numbers<[1], [0], [0], [1], [0, 0, 1, 1], [], []>} : vector<8x128xbf16>, vector<128x128xbf16>, vector<8x128xf32> -> vector<8x128xf32>
    %3 = arith.truncf %2 : vector<8x128xf32> to vector<8x128xbf16>
    %c0_3 = arith.constant 0 : index
    %c0_4 = arith.constant 0 : index
    %4 = vector.load %arg3[%c0_3, %c0_4] : memref<1x128xbf16, #tpu.memory_space<vmem>>, vector<1x128xbf16>
    %5 = vector.broadcast %4 : vector<1x128xbf16> to vector<8x128xbf16>
    %6 = arith.addf %3, %5 : vector<8x128xbf16>
    %cst_5 = arith.constant 0.000000e+00 : bf16
    %7 = vector.broadcast %cst_5 : bf16 to vector<8x128xbf16>
    %8 = arith.maximumf %6, %7 : vector<8x128xbf16>
    %c0_6 = arith.constant 0 : index
    %c0_7 = arith.constant 0 : index
    %9 = vector.load %arg4[%c0_6, %c0_7] : memref<128x128xbf16, #tpu.memory_space<vmem>>, vector<128x128xbf16>
    %cst_8 = arith.constant dense<0.000000e+00> : vector<8x128xf32>
    %10 = tpu.matmul %8, %9, %cst_8 {dimension_numbers = #tpu.dot_dimension_numbers<[1], [0], [0], [1], [0, 0, 1, 1], [], []>} : vector<8x128xbf16>, vector<128x128xbf16>, vector<8x128xf32> -> vector<8x128xf32>
    %11 = arith.truncf %10 : vector<8x128xf32> to vector<8x128xbf16>
    %c0_9 = arith.constant 0 : index
    %c0_10 = arith.constant 0 : index
    %12 = vector.load %arg5[%c0_9, %c0_10] : memref<1x128xbf16, #tpu.memory_space<vmem>>, vector<1x128xbf16>
    %13 = vector.broadcast %12 : vector<1x128xbf16> to vector<8x128xbf16>
    %14 = arith.addf %11, %13 : vector<8x128xbf16>
    %cst_11 = arith.constant 0.000000e+00 : bf16
    %15 = vector.broadcast %cst_11 : bf16 to vector<8x128xbf16>
    %16 = arith.maximumf %14, %15 : vector<8x128xbf16>
    %c0_12 = arith.constant 0 : index
    %c0_13 = arith.constant 0 : index
    %17 = vector.load %arg6[%c0_12, %c0_13] : memref<128x128xbf16, #tpu.memory_space<vmem>>, vector<128x128xbf16>
    %cst_14 = arith.constant dense<0.000000e+00> : vector<8x128xf32>
    %18 = tpu.matmul %16, %17, %cst_14 {dimension_numbers = #tpu.dot_dimension_numbers<[1], [0], [0], [1], [0, 0, 1, 1], [], []>} : vector<8x128xbf16>, vector<128x128xbf16>, vector<8x128xf32> -> vector<8x128xf32>
    %c0_15 = arith.constant 0 : index
    %c0_16 = arith.constant 0 : index
    %19 = vector.load %arg7[%c0_15, %c0_16] : memref<1x128xf32, #tpu.memory_space<vmem>>, vector<1x128xf32>
    %20 = vector.broadcast %19 : vector<1x128xf32> to vector<8x128xf32>
    %21 = arith.addf %18, %20 : vector<8x128xf32>
    %c0_17 = arith.constant 0 : index
    %c0_18 = arith.constant 0 : index
    %22 = vector.load %arg8[%c0_17, %c0_18] : memref<8x128xf32, #tpu.memory_space<vmem>>, vector<8x128xf32>
    tpu.vector_store %arg8[%c0_17, %c0_18], %21 {strides = array<i32>} : memref<8x128xf32, #tpu.memory_space<vmem>>, vector<8x128xf32>,
    return
  }
  func.func @transform_0(%arg0: i32) -> (i32, i32) {
    %c0_i32 = arith.constant 0 : i32
    %c0_i32_0 = arith.constant 0 : i32
    return %arg0, %c0_i32 : i32, i32
  }
  func.func @transform_1(%arg0: i32) -> (i32, i32) {
    %c0_i32 = arith.constant 0 : i32
    %c0_i32_0 = arith.constant 0 : i32
    %c0_i32_1 = arith.constant 0 : i32
    return %c0_i32, %c0_i32_0 : i32, i32
  }
  func.func @transform_2(%arg0: i32) -> (i32, i32) {
    %c0_i32 = arith.constant 0 : i32
    %c0_i32_0 = arith.constant 0 : i32
    %c0_i32_1 = arith.constant 0 : i32
    return %c0_i32, %c0_i32_0 : i32, i32
  }
  func.func @transform_3(%arg0: i32) -> (i32, i32) {
    %c0_i32 = arith.constant 0 : i32
    %c0_i32_0 = arith.constant 0 : i32
    %c0_i32_1 = arith.constant 0 : i32
    return %c0_i32, %c0_i32_0 : i32, i32
  }
  func.func @transform_4(%arg0: i32) -> (i32, i32) {
    %c0_i32 = arith.constant 0 : i32
    %c0_i32_0 = arith.constant 0 : i32
    %c0_i32_1 = arith.constant 0 : i32
    return %c0_i32, %c0_i32_0 : i32, i32
  }
  func.func @transform_5(%arg0: i32) -> (i32, i32) {
    %c0_i32 = arith.constant 0 : i32
    %c0_i32_0 = arith.constant 0 : i32
    %c0_i32_1 = arith.constant 0 : i32
    return %c0_i32, %c0_i32_0 : i32, i32
  }
  func.func @transform_6(%arg0: i32) -> (i32, i32) {
    %c0_i32 = arith.constant 0 : i32
    %c0_i32_0 = arith.constant 0 : i32
    %c0_i32_1 = arith.constant 0 : i32
    return %c0_i32, %c0_i32_0 : i32, i32
  }
  func.func @transform_7(%arg0: i32) -> (i32, i32) {
    %c0_i32 = arith.constant 0 : i32
    %c0_i32_0 = arith.constant 0 : i32
    return %arg0, %c0_i32 : i32, i32
  }
}

</mosaic_0001>

<bundles_post_ra>
// kernel: tpu_custom_call.1
= control target key start
LH: loop header
LB: loop body
LE: loop exit
PB: predicated region body
PF: predicated region fallthrough
CT: control target
= control target key end

     0   :  { %s1352_s0 = inlined_call_operand.hbm [shape: bf16[16,128], index: 0, kind: input, shape index: {}]   ;;  %s1353_s1 = inlined_call_operand.hbm [shape: bf16[128,128], index: 1, kind: input, shape index: {}]   ;;  %s1354_s2 = inlined_call_operand.vmem [shape: bf16[1,128], index: 2, kind: input, shape index: {}]   ;;  %s1355_s3 = inlined_call_operand.hbm [shape: bf16[128,128], index: 3, kind: input, shape index: {}]   ;;  %s1356_s4 = inlined_call_operand.vmem [shape: bf16[1,128], index: 4, kind: input, shape index: {}]   ;;  %s1357_s5 = inlined_call_operand.hbm [shape: bf16[128,128], index: 5, kind: input, shape index: {}]   ;;  %s1358_s6 = inlined_call_operand.vmem [shape: f32[1,128], index: 6, kind: input, shape index: {}]   ;;  %s1359_s7 = inlined_call_operand.hbm [shape: f32[16,128], index: 7, kind: output, shape index: {}]  }
   0x1   :  { %1360 = sst [smem:[#allocation15_spill]] %s1353_s1 }
   0x2   :  { %12 = vsyncpa [#allocation3], 0 }
   0x3   :  { %14 = vsyncpa [#allocation3 + $0x1], 0 }
   0x4   :  { %15 = vsyncpa [#allocation6], 0 }
   0x5   :  { %16 = vsyncpa [#allocation9], 0 }
   0x6   :  { %17 = vsyncpa [#allocation4], 0 }
   0x7   :  { %19 = vsyncpa [#allocation4 + $0x1], 0  ;;  %s1183_s24 = smov 0   ;;  %s1185_s25 = smov 0  }
   0x8   :  { %s1187_s26 = smov 0   ;;  %s1189_s27 = smov 0  }
   0x9 LB: > { %s1361_s1 = sld [smem:[#allocation15_spill]]  ;;  %s1207_s8 = sadd.s32 4294967295, %s1136_s27   ;;  %s1136_s27 = sphi %s1189_s27, %s1372_s27   ;;  %s1132_s26 = sphi %s1187_s26, %s1371_s26   ;;  %s1128_s25 = sphi %s1185_s25, %s1370_s25   ;;  %s1124_s24 = sphi %s1183_s24, %s1369_s24  }
   0xa   : > { %p725_p0 = scmp.ge.s32.totalorder %s1136_s27, 1  ;;  %p46_p1 = scmp.eq.s32.totalorder %s1207_s8, 0 }
   0xb   : > { %p208_p2 = scmp.lt.s32.totalorder %s1136_s27, 3  ;;  %s1138_s10 = smov [#allocation5]  }
   0xc   : > { %s221_s11 = sshll.u32 %s1138_s10, 4  ;;  %s236_s14 = sshll.u32 %s1355_s3, 4  ;;  %s222_s11 = int_to_ptr.vmem [resolvable:$true] %s221_s11  ;;  %s237_s14 = int_to_ptr.hbm [resolvable:$true] %s236_s14 }
   0xd   : > { %p1212_p3 = pnand %p725_p0, %p208_p2  ;;  %s253_s18 = sshll.u32 %s1357_s5, 4  ;;  %s254_s18 = int_to_ptr.hbm [resolvable:$true] %s253_s18 }
   0xe   : > { %s1139_s19 = smov [#allocation7]   ;;  %s1140_s21 = smov 64  }
   0xf   : > { %s219_s30 = sshll.u32 %s1361_s1, 4  ;;  %p878_p4 = pneg %p1212_p3  ;;  %s220_s30 = int_to_ptr.hbm [resolvable:$true] %s219_s30 }
  0x10   : > { %s238_s20 = sshll.u32 %s1139_s19, 4  ;;  %s1141_s22 = smov 4   ;;  %s239_s20 = int_to_ptr.vmem [resolvable:$true] %s238_s20 }
  0x11   : > { %p1224_p6 = pnand %p878_p4, %p46_p1  ;;  %s1142_s23 = smov [#allocation8]  }
  0x12   : > { %s255_s28 = sshll.u32 %s1142_s23, 4  ;;  %s724_s29 = sadd.s32 4294967294, %s1136_s27   ;;  %s256_s28 = int_to_ptr.vmem [resolvable:$true] %s255_s28 }
  0x13   : > { %881 = dma.hbm_to_vmem [thread:$0]  (!%p1224_p6), %s220_s30, 1024, %s222_s11, [#allocation6], %s1140_s21, %s1140_s21, %s1141_s22  }
  0x14   : > { %884 = dma.hbm_to_vmem [thread:$0]  (!%p1224_p6), %s237_s14, 1024, %s239_s20, [#allocation6], %s1140_s21, %s1140_s21, %s1141_s22  }
  0x15   : > { %887 = dma.hbm_to_vmem [thread:$0]  (!%p1224_p6), %s254_s18, 1024, %s256_s28, [#allocation9], %s1140_s21, %s1140_s21, %s1141_s22  }
  0x16   : > { %s1239_s10 = sadd.s32 1, %s1136_s27   ;;  %s32_s12 = sadd.s32 1, %s1132_s26 }
  0x17   : > { %s29_s30 = ssub.s32 %s1136_s27, %s1239_s10  ;;  %p39_p7 = scmp.ne.s32.totalorder %s1132_s26, %s1128_s25 }
  0x18   : > { %p30_p8 = scmp.eq.s32.totalorder %s29_s30, 0  ;;  %p40_p9 = scmp.eq.s32.totalorder %s1136_s27, 0 }
  0x19   : > { %p45_p10 = scmp.ne.s32.totalorder %s1128_s25, %s1124_s24  ;;  %p195_p11 = scmp.eq.s32.totalorder %s1207_s8, 1 }
  0x1a   : > { %s1251_s11 = scalar_select %p30_p8, %s1132_s26, %s32_s12  }
  0x1b   : > { %p1255_p12 = por %p46_p1, %p45_p10  ;;  %p1259_p13 = por %p195_p11, %p39_p7 }
  0x1c   : > { %p201_p0 = scmp.eq.s32.totalorder %s724_s29, 1  ;;  %p41_p2 = por %p40_p9, %p39_p7 }
  0x1d   : > { %s272_s15 = sand.u32 1, %s1132_s26   ;;  %p899_p6 = scmp.lt.s32.totalorder %s1136_s27, 2 }
  0x1e   : > { %p1264_p4 = por %p201_p0, %p45_p10  ;;  %s730_s17 = sshll.u32 %s272_s15, 2 }
  0x1f   : > { %s731_s18 = sshll.u32 %s1136_s27, 2  ;;  %s276_s23 = scalar_lea.vmem [#allocation2], %s730_s17 }
  0x20   : > { %s280_s21 = scalar_lea.hbm %s1352_s0, %s731_s18  ;;  %s284_s28 = sshll.u32 %s276_s23, 4  ;;  %s285_s28 = int_to_ptr.vmem [resolvable:$true] %s284_s28 }
  0x21   : > { %s282_s22 = sshll.u32 %s280_s21, 4  ;;  %p1273_p8 = pnand %p899_p6, %p41_p2  ;;  %s283_s22 = int_to_ptr.hbm [resolvable:$true] %s282_s22 }
  0x22   : > { %s273_s12 = scalar_lea.sflag [#allocation3], %s272_s15  ;;  %s1032_s30 = sshra.s32 %s283_s22, 4  ;;  %s1033_s30 = int_to_ptr.hbm [resolvable:$true] %s1032_s30 }
  0x23   : > { %s1034_s1 = scalar_lea.hbm %s1033_s30, 4  ;;  %p1036_p9 = pneg %p1273_p8 }
  0x24   : > { %p1035_p7 = scmp.ne.s32.totalorder %s1033_s30, %s1034_s1  ;;  %s1039_s17 = scalar_lea.hbm %s1352_s0, 8 }
  0x25   : > { %p1040_p0 = scmp.lt.s32.totalorder %s1033_s30, %s1352_s0  ;;  %p1041_p2 = scmp.lt.s32.totalorder %s1039_s17, %s1034_s1 }
  0x26   : > { %p1037_p10 = pnand %p1036_p9, %p1035_p7 }
  0x27   : > { %p1042_p6 = por %p1041_p2, %p1040_p0 }
  0x28   : > { %p1038_p11 = pneg %p1037_p10 }
  0x2a   : > { %p1043_p5 = pnand %p1042_p6, %p1038_p11 }
  0x2c   : > { %1046 = shalt.err (!%p1043_p5)
}
  0x2d   : > { %891 = dma.hbm_to_vmem [thread:$0]  (!%p1273_p8), %s283_s22, 64, %s285_s28, %s273_s12  }
  0x2e   : > { %293 = sbr.rel (%p1212_p3) target bundleno = 500 (0x1f4), region = 48  ;;  %s1290_s15 = sand.u32 (!%p1212_p3), 1, %s1128_s25  }
  0x2f   : > { %s733_s23 = sshll.u32 (!%p1212_p3), %s1290_s15, 2  ;;  %s296_s18 = scalar_lea.sflag (!%p1212_p3), [#allocation3], %s1290_s15 }
  0x30   : > { %s1294_s19 = scalar_lea.vmem (!%p1212_p3), [#allocation2], %s733_s23 }
  0x33   : > { %1107 = dma.done.wait (%p1255_p12), %s296_s18, 64  }
  0x34   : > { %1109 = vsyncadd (%p1255_p12), %s296_s18, 4294967232 }
  0x35   : > { %1111 = dma.done.wait (%p46_p1), [#allocation6], 2048  }
  0x36   : > { %1113 = vsyncadd (%p46_p1), [#allocation6], 4294965248 }
  0x37   : > { %1115 = dma.done.wait (%p46_p1), [#allocation9], 1024  }
  0x38   : > { %1117 = vsyncadd (%p46_p1), [#allocation9], 4294966272  ;;  %v845_v0 = vld [vmem:[#allocation5 + $0x38] sm:$0xff]  ;;  %v844_v1 = vld [vmem:[#allocation5 + $0x30] sm:$0xff]  ;;  %s835_s28 = sshll.u32 %s1207_s8, 3  ;;  %s737_s29 = sshll.u32 %s1290_s15, 3 }
  0x39   : > { %411 = vmatpush.bf16.msra.mxu0 %v845_v0  ;;  %v853_v2 = vld [vmem:[#allocation7 + $0x38] sm:$0xff]  ;;  %v852_v3 = vld [vmem:[#allocation7 + $0x30] sm:$0xff]  ;;  %v843_v4 = vld [vmem:[#allocation5 + $0x28] sm:$0xff]  ;;  %s620_s17 = scalar_lea.hbm %s1359_s7, %s835_s28  ;;  %s345_s23 = scalar_lea.vmem [#allocation10], %s737_s29 }
  0x3a   : > { %501 = vmatpush.bf16.msra.mxu1 %v853_v2  ;;  %v851_v5 = vld [vmem:[#allocation7 + $0x28] sm:$0xff]  ;;  %v842_v6 = vld [vmem:[#allocation5 + $0x20] sm:$0xff]  ;;  %v841_v8 = vld [vmem:[#allocation5 + $0x18] sm:$0xff]  ;;  %s622_s18 = sshll.u32 %s345_s23, 4  ;;  %s610_s1 = scalar_lea.sflag [#allocation4], %s1290_s15  ;;  %s623_s18 = int_to_ptr.vmem [resolvable:$true] %s622_s18 }
  0x3b   : > { %v850_v7 = vld [vmem:[#allocation7 + $0x20] sm:$0xff]  ;;  %v849_v9 = vld [vmem:[#allocation7 + $0x18] sm:$0xff]  ;;  %v840_v10 = vld [vmem:[#allocation5 + $0x10] sm:$0xff]  ;;  %s1082_s28 = scalar_lea.hbm %s1359_s7, 16 }
  0x3c   : > { %v839_v11 = vld [vmem:[#allocation5 + $0x8] sm:$0xff]  ;;  %v838_v12 = vld [vmem:[#allocation5] sm:$0xff]  ;;  %v346_v13 = vld [vmem:[%s1294_s19] sm:$0xf]  ;;  %s624_s19 = sshll.u32 %s620_s17, 4  ;;  %s625_s19 = int_to_ptr.hbm [resolvable:$true] %s624_s19 }
  0x3d   : > { %412 = vmatpush.bf16.msra.mxu0 %v844_v1  ;;  %v848_v14 = vld [vmem:[#allocation7 + $0x10] sm:$0xff]  ;;  %v847_v15 = vld [vmem:[#allocation7 + $0x8] sm:$0xff]  ;;  %v846_v16 = vld [vmem:[#allocation7] sm:$0xff]  ;;  %s1076_s8 = sshra.s32 %s625_s19, 4  ;;  %s1077_s8 = int_to_ptr.hbm [resolvable:$true] %s1076_s8 }
  0x3e   : > { %502 = vmatpush.bf16.msra.mxu1 %v852_v3  ;;  %v861_v17 = vld [vmem:[#allocation8 + $0x38] sm:$0xff]  ;;  %v860_v18 = vld [vmem:[#allocation8 + $0x30] sm:$0xff]  ;;  %v859_v19 = vld [vmem:[#allocation8 + $0x28] sm:$0xff]  ;;  %s1078_s9 = scalar_lea.hbm %s1077_s8, 8  ;;  %p1083_p12 = scmp.lt.s32.totalorder %s1077_s8, %s1359_s7 }
  0x3f   : > { %595 = vmatpush.bf16.msra.mxu2 %v861_v17  ;;  %v858_v20 = vld [vmem:[#allocation8 + $0x20] sm:$0xff]  ;;  %v425_v21 = vld [vmem:[%s1354_s2] sm:$0x1]  ;;  %v856_v33 = vld [vmem:[#allocation8 + $0x10] sm:$0xff]  ;;  %p1079_p1 = scmp.ne.s32.totalorder %s1077_s8, %s1078_s9  ;;  %p1084_p8 = scmp.lt.s32.totalorder %s1082_s28, %s1078_s9 }
  0x40   : > { %v427_v22 = vpack.i.b16 %v425_v21, %v425_v21  ;;  %v857_v23 = vld [vmem:[#allocation8 + $0x18] sm:$0xff]  ;;  %v855_v34 = vld [vmem:[#allocation8 + $0x8] sm:$0xff]  ;;  %v854_v35 = vld [vmem:[#allocation8] sm:$0xff] }
  0x41   : > { %413 = vmatpush.bf16.msra.mxu0 %v843_v4  ;;  %v515_v36 = vld [vmem:[%s1356_s4] sm:$0x1]  ;;  %p1080_p3 = pnand %p1079_p1, %p1259_p13  ;;  %p1085_p7 = por %p1084_p8, %p1083_p12 }
  0x42   : > { %503 = vmatpush.bf16.msra.mxu1 %v851_v5  ;;  %v429_v24 = vperm.slane %v427_v22, 0  ;;  %v517_v37 = vpack.i.b16 %v515_v36, %v515_v36  ;;  %v941_v47 = vld [vmem:[%s1358_s6] ss:$0 sm:$0xff] }
  0x43   : > { %596 = vmatpush.bf16.msra.mxu2 %v860_v18  ;;  %p1081_p5 = pneg %p1080_p3 }
  0x44   : > { %v431_v27 = vunpack.c.l.bf16 %v429_v24  ;;  %v519_v38 = vperm.slane %v517_v37, 0 }
  0x45   : > { %414 = vmatpush.bf16.msra.mxu0 %v842_v6  ;;  %p1086_p9 = pnand %p1085_p7, %p1081_p5 }
  0x46   : > { %504 = vmatpush.bf16.msra.mxu1 %v850_v7  ;;  %v521_v41 = vunpack.c.l.bf16 %v519_v38 }
  0x47   : > { %597 = vmatpush.bf16.msra.mxu2 %v859_v19 }
  0x49   : > { %415 = vmatpush.bf16.msra.mxu0 %v841_v8 }
  0x4a   : > { %505 = vmatpush.bf16.msra.mxu1 %v849_v9 }
  0x4b   : > { %598 = vmatpush.bf16.msra.mxu2 %v858_v20 }
  0x4d   : > { %416 = vmatpush.bf16.msra.mxu0 %v840_v10 }
  0x4e   : > { %506 = vmatpush.bf16.msra.mxu1 %v848_v14 }
  0x4f   : > { %599 = vmatpush.bf16.msra.mxu2 %v857_v23 }
  0x51   : > { %417 = vmatpush.bf16.msra.mxu0 %v839_v11 }
  0x52   : > { %507 = vmatpush.bf16.msra.mxu1 %v847_v15 }
  0x53   : > { %600 = vmatpush.bf16.msra.mxu2 %v856_v33 }
  0x55   : > { %418 = vmatpush.bf16.msra.mxu0 %v838_v12 }
  0x56   : > { %508 = vmatpush.bf16.msra.mxu1 %v846_v16 }
  0x57   : > { %601 = vmatpush.bf16.msra.mxu2 %v855_v34 }
  0x58   : > { %419 = vmatmul.bf16.vlgmr.msra.gmra.mxu0 %v346_v13 }
  0x5b   : > { %602 = vmatpush.bf16.msra.mxu2 %v854_v35 }
  0xd5   : > { %v420_v25 = vpop.f32.mrf.mxu0 }
  0xd6   : > { %v424_v26 = vpack.c.bf16 %v420_v25, %v420_v25 }
  0xd8   : > { %v430_v28 = vunpack.c.l.bf16 %v424_v26 }
  0xda   : > { %v432_v29 = vadd.f32 %v431_v27, %v430_v28 }
  0xdc   : > { %v435_v30 = vmax.f32 %v432_v29, 0.0 }
  0xdd   : > { %v422_v31 = vpop.f32.mrf.mxu0 }
  0xde   : > { %v436_v32 = vpack.c.bf16 %v435_v30, %v435_v30 }
  0xe0   : > { %509 = vmatmul.bf16.vlgmr.msra.gmra.mxu1 %v436_v32 }
 0x15d   : > { %v510_v39 = vpop.f32.mrf.mxu1 }
 0x15e   : > { %v514_v40 = vpack.c.bf16 %v510_v39, %v510_v39 }
 0x160   : > { %v520_v42 = vunpack.c.l.bf16 %v514_v40 }
 0x162   : > { %v522_v43 = vadd.f32 %v521_v41, %v520_v42 }
 0x164   : > { %v525_v44 = vmax.f32 %v522_v43, 0.0 }
 0x165   : > { %v512_v45 = vpop.f32.mrf.mxu1 }
 0x166   : > { %v526_v46 = vpack.c.bf16 %v525_v44, %v525_v44 }
 0x168   : > { %603 = vmatmul.bf16.vlgmr.msra.gmra.mxu2 %v526_v46 }
 0x1eb   : > { %v604_v48 = vpop.f32.mrf.mxu2 }
 0x1ec   : > { %v605_v49 = vadd.f32 %v941_v47, %v604_v48 }
 0x1ee   : > { %608 = vst [vmem:[%s345_s23] sm:$0xff] %v605_v49 }
 0x1ef   : > { %1089 = shalt.err (!%p1086_p9)
}
 0x1f0   : > { %876 = dma.vmem_to_hbm [thread:$0]  (%p1259_p13), %s623_s18, 128, %s625_s19, %s610_s1  }
 0x1f3   : > { %v606_v50 = vpop.f32.mrf.mxu2 }
 0x1f4 PF: > { %s636_s15 = sand.u32 1, %s1124_s24   ;;  %p1368_p10 = scmp.ge.s32.totalorder %s1136_s27, 2 }
 0x1f5   : > { %s637_s30 = scalar_lea.sflag [#allocation4], %s636_s15 }
 0x1f6   : > { %p893_p11 = pnand %p1368_p10, %p1264_p4 }
 0x1f8   : > { %p894_p0 = pneg %p893_p11 }
 0x1fa   : > { %1119 = dma.done.wait (%p894_p0), %s637_s30, 128  }
 0x1fb   : > { %1121 = vsyncadd (%p894_p0), %s637_s30, 4294967168  ;;  %p22_p2 = scmp.ge.s32.totalorder %s1239_s10, 4   ;;  %s1369_s24 = smov %s1128_s25 }
 0x1fc   : > { %s1370_s25 = smov %s1132_s26  ;;  %s1371_s26 = smov %s1251_s11 }
 0x1fd   : > { %s1372_s27 = smov %s1239_s10  ;;  %24 = sbr.rel (!%p22_p2) target bundleno = 9 (0x9), region = 105 }
 0x202   :  { %643 = vsyncpa [#allocation3], 1 }
 0x203   :  { %645 = vsyncpa [#allocation3 + $0x1], 1 }
 0x204   :  { %646 = vsyncpa [#allocation6], 1 }
 0x205   :  { %647 = vsyncpa [#allocation9], 1 }
 0x206   :  { %648 = vsyncpa [#allocation4], 1 }
 0x207   :  { %650 = vsyncpa [#allocation4 + $0x1], 1 }

</bundles_post_ra>
